<compile_context>
chip_gen: v5e
topology: v5e:2x2
jax: 0.10.0
libtpu: 0.0.40
codegen_flags: <defaults>
</compile_context>

<pallas_src>
import jax
import jax.numpy as jnp
import numpy as np
from jax import lax
from jax.experimental import pallas as pl
from jax.experimental.pallas import tpu as pltpu

_SUBLANE = 8
_LANE = 128
_RESIDENT_VMEM_BUDGET = 40 << 20   # use the weight-resident kernel below this
_VMEM_FLOOR = 32 << 20             # never ask for less scoped VMEM than this
_VMEM_CEIL = 56 << 20              # stay under v7x's 64 MiB physical VMEM


def _round_up(x, q):
    return ((x + q - 1) // q) * q


def _divisor_tile(total, desired, quantum):
    """Largest multiple of `quantum` that divides `total` and is <= desired."""
    best = quantum
    d = quantum
    limit = min(total, max(desired, quantum))
    while d <= limit:
        if total % d == 0:
            best = d
        d += quantum
    return best


def _dot_nt(x, w):
    """(m, k) . (n, k)^T on the MXU with f32 accumulation (no W.T in HBM)."""
    return lax.dot_general(
        x, w,
        dimension_numbers=(((1,), (1,)), ((), ())),
        preferred_element_type=jnp.float32)


# --------------------------------------------------------------------------
# Path 1: weight resident in VMEM (small heads).
# --------------------------------------------------------------------------
def _mlm_resident_kernel(x_ref, w_ref, b_ref, o_ref):
    """x:(tm,h) bf16, w:(V,h) bf16, b:(1,V) f32, o:(tm,V)."""
    logits = _dot_nt(x_ref[...], w_ref[...]) + b_ref[...]
    m = jnp.max(logits, axis=-1, keepdims=True)
    shifted = logits - m
    lse = jnp.log(jnp.sum(jnp.exp(shifted), axis=-1, keepdims=True))
    o_ref[...] = (shifted - lse).astype(o_ref.dtype)


def _call_resident(x2, wq, b2, m_pad, tile_m, vocab, hidden, out_dtype,
                   need_bytes):
    grid = (m_pad // tile_m,)
    vmem_limit = int(min(max(need_bytes * 13 // 10, _VMEM_FLOOR), _VMEM_CEIL))

    def build(const_block_kwargs):
        return pl.pallas_call(
            _mlm_resident_kernel,
            out_shape=jax.ShapeDtypeStruct((m_pad, vocab), out_dtype),
            grid_spec=pltpu.PrefetchScalarGridSpec(
                num_scalar_prefetch=0,
                grid=grid,
                in_specs=[
                    pl.BlockSpec((tile_m, hidden), lambda i: (i, 0)),
                    pl.BlockSpec((vocab, hidden), lambda i: (0, 0),
                                 **const_block_kwargs),
                    pl.BlockSpec((1, vocab), lambda i: (0, 0),
                                 **const_block_kwargs),
                ],
                out_specs=pl.BlockSpec((tile_m, vocab), lambda i: (i, 0)),
            ),
            compiler_params=pltpu.CompilerParams(
                dimension_semantics=("parallel",),
                vmem_limit_bytes=vmem_limit),
        )

    try:
        # Constant-index weight/bias blocks: single-buffer them so only one
        # copy of the weight occupies VMEM.
        return build(dict(pipeline_mode=pl.Buffered(1)))(x2, wq, b2)
    except Exception:   # jax versions without pipeline_mode support
        return build({})(x2, wq, b2)


# --------------------------------------------------------------------------
# Path 2: vocab-tiled two-pass online log-softmax (weight streams from HBM).
# --------------------------------------------------------------------------
def _mlm_streaming_kernel(x_ref, w_ref, b_ref, o_ref, m_sc, l_sc):
    """x:(tm,h) bf16, w:(tv,h) bf16, b:(1,tv) f32, o:(tm,tv); scratch (tm,1)."""
    p = pl.program_id(1)   # 0: accumulate max / sum-exp, 1: write output
    v = pl.program_id(2)

    @pl.when((p == 0) & (v == 0))
    def _():
        m_sc[...] = jnp.full(m_sc.shape, -jnp.inf, m_sc.dtype)
        l_sc[...] = jnp.zeros(l_sc.shape, l_sc.dtype)

    logits = _dot_nt(x_ref[...], w_ref[...]) + b_ref[...]

    @pl.when(p == 0)
    def _():
        m_prev = m_sc[...]
        m_new = jnp.maximum(m_prev, jnp.max(logits, axis=-1, keepdims=True))
        l_sc[...] = (l_sc[...] * jnp.exp(m_prev - m_new)
                     + jnp.sum(jnp.exp(logits - m_new), axis=-1, keepdims=True))
        m_sc[...] = m_new

    @pl.when(p == 1)
    def _():
        lse = m_sc[...] + jnp.log(l_sc[...])
        o_ref[...] = (logits - lse).astype(o_ref.dtype)


def _call_streaming(x2, wq, b2, m_pad, tile_m, tile_v, vocab, hidden,
                    out_dtype):
    # Pad vocab to a lane multiple so tile_v tiles cleanly. Padded columns get
    # a huge negative bias -> exp() == 0, so they never perturb the
    # normalizer; they are sliced off by the caller.
    vocab_pad = _round_up(vocab, _LANE)
    tile_v = _divisor_tile(vocab_pad, max(tile_v, _LANE), _LANE)
    if vocab_pad != vocab:
        wq = jnp.pad(wq, ((0, vocab_pad - vocab), (0, 0)))
        b2 = jnp.pad(b2, ((0, 0), (0, vocab_pad - vocab)),
                     constant_values=-1e30)

    m_tiles = m_pad // tile_m
    v_tiles = vocab_pad // tile_v
    grid = (m_tiles, 2, v_tiles)

    out_bytes = jnp.dtype(out_dtype).itemsize
    need = (2 * tile_v * hidden * 2        # weight tiles (bf16, double buffer)
            + 2 * tile_v * 4               # bias tiles
            + 2 * tile_m * hidden * 2      # x tiles
            + 2 * tile_m * tile_v * out_bytes
            + 2 * tile_m * 4 * 2)          # running max / sum-exp scratch
    vmem_limit = int(min(max(need * 13 // 10, _VMEM_FLOOR), _VMEM_CEIL))

    return pl.pallas_call(
        _mlm_streaming_kernel,
        out_shape=jax.ShapeDtypeStruct((m_pad, vocab_pad), out_dtype),
        grid_spec=pltpu.PrefetchScalarGridSpec(
            num_scalar_prefetch=0,
            grid=grid,
            in_specs=[
                pl.BlockSpec((tile_m, hidden), lambda i, p, v: (i, 0)),
                pl.BlockSpec((tile_v, hidden), lambda i, p, v: (v, 0)),
                pl.BlockSpec((1, tile_v), lambda i, p, v: (0, v)),
            ],
            # Pass 0 pins the output block index to (i, 0) -> nothing is
            # flushed while the statistics accumulate; pass 1 visits and fully
            # overwrites every (i, v) block exactly once.
            out_specs=pl.BlockSpec((tile_m, tile_v), lambda i, p, v: (i, p * v)),
            scratch_shapes=[pltpu.VMEM((tile_m, 1), jnp.float32),
                            pltpu.VMEM((tile_m, 1), jnp.float32)],
        ),
        compiler_params=pltpu.CompilerParams(
            dimension_semantics=("parallel", "arbitrary", "arbitrary"),
            vmem_limit_bytes=vmem_limit),
    )(x2, wq, b2)


# --------------------------------------------------------------------------
# Wrapper mirroring MaskedLanguageModel.forward
# --------------------------------------------------------------------------
def masked_language_model(x, weight, bias, *, tile_m=256, tile_v=2048,
                          out_dtype=None, force_streaming=False):
    """log_softmax(x @ W.T + b, axis=-1), fused in one Pallas kernel."""
    orig_dtype = x.dtype
    out_dtype = orig_dtype if out_dtype is None else out_dtype
    *lead, hidden = x.shape
    vocab = weight.shape[0]

    m = int(np.prod(lead)) if lead else 1

    # bf16 MXU inputs; f32 accumulation + f32 softmax inside the kernel.
    # NOTE: in a real model keep the weight stored in bf16 so this cast is free.
    x2 = x.reshape(m, hidden).astype(jnp.bfloat16)
    wq = weight.astype(jnp.bfloat16)                  # stays (vocab, hidden)
    b2 = bias.astype(jnp.float32).reshape(1, vocab)

    # Row padding only to the 8-sublane quantum (<= 7 rows); tile_m divides it.
    m_pad = _round_up(m, _SUBLANE)
    if m_pad != m:
        x2 = jnp.pad(x2, ((0, m_pad - m), (0, 0)))
    tile_m = _divisor_tile(m_pad, max(tile_m, _SUBLANE), _SUBLANE)
    # Guarantee >= 2 row programs when possible (2 TensorCores on v7x, and it
    # lets the pipeline prefetch tile i+1).
    if m_pad // tile_m < 2 and m_pad // _SUBLANE >= 2:
        tile_m = _divisor_tile(m_pad, max(tile_m // 2, _SUBLANE), _SUBLANE)

    out_bytes = jnp.dtype(out_dtype).itemsize
    resident_need = (2 * vocab * hidden * 2            # weight (conservative 2x)
                     + vocab * 4                        # bias
                     + 2 * tile_m * hidden * 2          # x tiles
                     + 2 * tile_m * vocab * out_bytes)  # output tiles
    use_resident = (not force_streaming) and resident_need <= _RESIDENT_VMEM_BUDGET

    if use_resident:
        out = _call_resident(x2, wq, b2, m_pad, tile_m, vocab, hidden,
                             out_dtype, resident_need)
    else:
        out = _call_streaming(x2, wq, b2, m_pad, tile_m, tile_v, vocab, hidden,
                              out_dtype)

    out = out[:m, :vocab].reshape(*lead, vocab)
    return out.astype(out_dtype)


def _reference_mlm(x, weight, bias):
    """float64 numpy re-implementation of the torch forward (for checking)."""
    xn = np.asarray(x, dtype=np.float64)
    wn = np.asarray(weight, dtype=np.float64)
    bn = np.asarray(bias, dtype=np.float64)
    logits = xn @ wn.T + bn
    shifted = logits - logits.max(axis=-1, keepdims=True)
    return shifted - np.log(np.exp(shifted).sum(axis=-1, keepdims=True))


if __name__ == "__main__":
    batch, seq, hidden, vocab = 2, 8, 32, 512

    key = jax.random.PRNGKey(0)
    kx, kw, kb = jax.random.split(key, 3)
    x = jax.random.normal(kx, (batch, seq, hidden), dtype=jnp.float32)
    # torch.nn.Linear-style init (uniform in +-1/sqrt(hidden)), deterministic.
    bound = 1.0 / float(np.sqrt(hidden))
    weight = jax.random.uniform(kw, (vocab, hidden), jnp.float32, -bound, bound)
    bias = jax.random.uniform(kb, (vocab,), jnp.float32, -bound, bound)

    ref = _reference_mlm(x, weight, bias)

    # Path 1: weight-resident fused kernel (default for small heads).
    out = jax.block_until_ready(masked_language_model(x, weight, bias))
    assert out.shape == (batch, seq, vocab)
    assert out.dtype == jnp.float32
    np.testing.assert_allclose(np.asarray(out), ref, rtol=2e-2, atol=2e-2)
    row_lse = np.log(np.exp(np.asarray(out, np.float64)).sum(-1))
    np.testing.assert_allclose(row_lse, 0.0, atol=1e-3)

    # Path 2: vocab-tiled online log-softmax (what large heads / v7x use).
    out_s = jax.block_until_ready(
        masked_language_model(x, weight, bias, tile_v=128,
                              force_streaming=True))
    assert out_s.shape == (batch, seq, vocab)
    assert out_s.dtype == jnp.float32
    np.testing.assert_allclose(np.asarray(out_s), ref, rtol=2e-2, atol=2e-2)
    row_lse_s = np.log(np.exp(np.asarray(out_s, np.float64)).sum(-1))
    np.testing.assert_allclose(row_lse_s, 0.0, atol=1e-3)
    np.testing.assert_allclose(np.asarray(out_s), np.asarray(out),
                               rtol=1e-3, atol=1e-3)

    print("KERNEL_OK")
</pallas_src>

<mosaic_0001>
module attributes {stable_mosaic.version = 11 : i64} {
  func.func @_mlm_resident_kernel(%arg0: i32, %arg1: memref<8x32xbf16, #tpu.memory_space<vmem>>, %arg2: memref<512x32xbf16, #tpu.memory_space<vmem>>, %arg3: memref<1x512xf32, #tpu.memory_space<vmem>>, %arg4: memref<8x512xf32, #tpu.memory_space<vmem>>) attributes {dimension_semantics = [#tpu.dimension_semantics<parallel>], iteration_bounds = array<i64: 2>, scalar_prefetch = 0 : i64, scratch_operands = 0 : i64, tpu.core_type = #tpu.core_type<tc>, window_params = [{transform_indices = @transform_0, window_bounds = array<i64: 8, 32>}, {pipeline_mode = #tpu.pipeline_mode<synchronous>, transform_indices = @transform_1, window_bounds = array<i64: 512, 32>}, {pipeline_mode = #tpu.pipeline_mode<synchronous>, transform_indices = @transform_2, window_bounds = array<i64: 1, 512>}, {transform_indices = @transform_3, window_bounds = array<i64: 8, 512>}]} {
    %c0 = arith.constant 0 : index
    %c0_0 = arith.constant 0 : index
    %0 = vector.load %arg1[%c0, %c0_0] : memref<8x32xbf16, #tpu.memory_space<vmem>>, vector<8x32xbf16>
    %c0_1 = arith.constant 0 : index
    %c0_2 = arith.constant 0 : index
    %1 = vector.load %arg2[%c0_1, %c0_2] : memref<512x32xbf16, #tpu.memory_space<vmem>>, vector<512x32xbf16>
    %cst = arith.constant dense<0.000000e+00> : vector<8x512xf32>
    %2 = tpu.matmul %0, %1, %cst {dimension_numbers = #tpu.dot_dimension_numbers<[1], [1], [0], [0], [0, 0, 1, 0], [], []>} : vector<8x32xbf16>, vector<512x32xbf16>, vector<8x512xf32> -> vector<8x512xf32>
    %c0_3 = arith.constant 0 : index
    %c0_4 = arith.constant 0 : index
    %3 = vector.load %arg3[%c0_3, %c0_4] : memref<1x512xf32, #tpu.memory_space<vmem>>, vector<1x512xf32>
    %4 = vector.broadcast %3 : vector<1x512xf32> to vector<8x512xf32>
    %5 = arith.addf %2, %4 : vector<8x512xf32>
    %cst_5 = arith.constant dense<0xFF800000> : vector<8xf32>
    %6 = vector.multi_reduction <maximumf>, %5, %cst_5 [1] : vector<8x512xf32> to vector<8xf32>
    %7 = vector.shape_cast %6 : vector<8xf32> to vector<8x1xf32>
    %8 = vector.broadcast %7 : vector<8x1xf32> to vector<8x512xf32>
    %9 = arith.subf %5, %8 : vector<8x512xf32>
    %10 = math.exp %9 : vector<8x512xf32>
    %cst_6 = arith.constant dense<0.000000e+00> : vector<8xf32>
    %11 = vector.multi_reduction <add>, %10, %cst_6 [1] : vector<8x512xf32> to vector<8xf32>
    %12 = vector.shape_cast %11 : vector<8xf32> to vector<8x1xf32>
    %13 = math.log %12 : vector<8x1xf32>
    %14 = vector.broadcast %13 : vector<8x1xf32> to vector<8x512xf32>
    %15 = arith.subf %9, %14 : vector<8x512xf32>
    %c0_7 = arith.constant 0 : index
    %c0_8 = arith.constant 0 : index
    %16 = vector.load %arg4[%c0_7, %c0_8] : memref<8x512xf32, #tpu.memory_space<vmem>>, vector<8x512xf32>
    tpu.vector_store %arg4[%c0_7, %c0_8], %15 {strides = array<i32>} : memref<8x512xf32, #tpu.memory_space<vmem>>, vector<8x512xf32>,
    return
  }
  func.func @transform_0(%arg0: i32) -> (i32, i32) {
    %c0_i32 = arith.constant 0 : i32
    %c0_i32_0 = arith.constant 0 : i32
    return %arg0, %c0_i32 : i32, i32
  }
  func.func @transform_1(%arg0: i32) -> (i32, i32) {
    %c0_i32 = arith.constant 0 : i32
    %c0_i32_0 = arith.constant 0 : i32
    %c0_i32_1 = arith.constant 0 : i32
    return %c0_i32, %c0_i32_0 : i32, i32
  }
  func.func @transform_2(%arg0: i32) -> (i32, i32) {
    %c0_i32 = arith.constant 0 : i32
    %c0_i32_0 = arith.constant 0 : i32
    %c0_i32_1 = arith.constant 0 : i32
    return %c0_i32, %c0_i32_0 : i32, i32
  }
  func.func @transform_3(%arg0: i32) -> (i32, i32) {
    %c0_i32 = arith.constant 0 : i32
    %c0_i32_0 = arith.constant 0 : i32
    return %arg0, %c0_i32 : i32, i32
  }
}

module attributes {stable_mosaic.version = 11 : i64} {
  func.func @_mlm_resident_kernel(%arg0: i32, %arg1: memref<8x32xbf16, #tpu.memory_space<vmem>>, %arg2: memref<512x32xbf16, #tpu.memory_space<vmem>>, %arg3: memref<1x512xf32, #tpu.memory_space<vmem>>, %arg4: memref<8x512xf32, #tpu.memory_space<vmem>>) attributes {dimension_semantics = [#tpu.dimension_semantics<parallel>], iteration_bounds = array<i64: 2>, scalar_prefetch = 0 : i64, scratch_operands = 0 : i64, tpu.core_type = #tpu.core_type<tc>, window_params = [{transform_indices = @transform_0, window_bounds = array<i64: 8, 32>}, {pipeline_mode = #tpu.pipeline_mode<synchronous>, transform_indices = @transform_1, window_bounds = array<i64: 512, 32>}, {pipeline_mode = #tpu.pipeline_mode<synchronous>, transform_indices = @transform_2, window_bounds = array<i64: 1, 512>}, {transform_indices = @transform_3, window_bounds = array<i64: 8, 512>}]} {
    %c0 = arith.constant 0 : index
    %c0_0 = arith.constant 0 : index
    %0 = vector.load %arg1[%c0, %c0_0] : memref<8x32xbf16, #tpu.memory_space<vmem>>, vector<8x32xbf16>
    %c0_1 = arith.constant 0 : index
    %c0_2 = arith.constant 0 : index
    %1 = vector.load %arg2[%c0_1, %c0_2] : memref<512x32xbf16, #tpu.memory_space<vmem>>, vector<512x32xbf16>
    %cst = arith.constant dense<0.000000e+00> : vector<8x512xf32>
    %2 = tpu.matmul %0, %1, %cst {dimension_numbers = #tpu.dot_dimension_numbers<[1], [1], [0], [0], [0, 0, 1, 0], [], []>} : vector<8x32xbf16>, vector<512x32xbf16>, vector<8x512xf32> -> vector<8x512xf32>
    %c0_3 = arith.constant 0 : index
    %c0_4 = arith.constant 0 : index
    %3 = vector.load %arg3[%c0_3, %c0_4] : memref<1x512xf32, #tpu.memory_space<vmem>>, vector<1x512xf32>
    %4 = vector.broadcast %3 : vector<1x512xf32> to vector<8x512xf32>
    %5 = arith.addf %2, %4 : vector<8x512xf32>
    %cst_5 = arith.constant dense<0xFF800000> : vector<8xf32>
    %6 = vector.multi_reduction <maximumf>, %5, %cst_5 [1] : vector<8x512xf32> to vector<8xf32>
    %7 = vector.shape_cast %6 : vector<8xf32> to vector<8x1xf32>
    %8 = vector.broadcast %7 : vector<8x1xf32> to vector<8x512xf32>
    %9 = arith.subf %5, %8 : vector<8x512xf32>
    %10 = math.exp %9 : vector<8x512xf32>
    %cst_6 = arith.constant dense<0.000000e+00> : vector<8xf32>
    %11 = vector.multi_reduction <add>, %10, %cst_6 [1] : vector<8x512xf32> to vector<8xf32>
    %12 = vector.shape_cast %11 : vector<8xf32> to vector<8x1xf32>
    %13 = math.log %12 : vector<8x1xf32>
    %14 = vector.broadcast %13 : vector<8x1xf32> to vector<8x512xf32>
    %15 = arith.subf %9, %14 : vector<8x512xf32>
    %c0_7 = arith.constant 0 : index
    %c0_8 = arith.constant 0 : index
    %16 = vector.load %arg4[%c0_7, %c0_8] : memref<8x512xf32, #tpu.memory_space<vmem>>, vector<8x512xf32>
    tpu.vector_store %arg4[%c0_7, %c0_8], %15 {strides = array<i32>} : memref<8x512xf32, #tpu.memory_space<vmem>>, vector<8x512xf32>,
    return
  }
  func.func @transform_0(%arg0: i32) -> (i32, i32) {
    %c0_i32 = arith.constant 0 : i32
    %c0_i32_0 = arith.constant 0 : i32
    return %arg0, %c0_i32 : i32, i32
  }
  func.func @transform_1(%arg0: i32) -> (i32, i32) {
    %c0_i32 = arith.constant 0 : i32
    %c0_i32_0 = arith.constant 0 : i32
    %c0_i32_1 = arith.constant 0 : i32
    return %c0_i32, %c0_i32_0 : i32, i32
  }
  func.func @transform_2(%arg0: i32) -> (i32, i32) {
    %c0_i32 = arith.constant 0 : i32
    %c0_i32_0 = arith.constant 0 : i32
    %c0_i32_1 = arith.constant 0 : i32
    return %c0_i32, %c0_i32_0 : i32, i32
  }
  func.func @transform_3(%arg0: i32) -> (i32, i32) {
    %c0_i32 = arith.constant 0 : i32
    %c0_i32_0 = arith.constant 0 : i32
    return %arg0, %c0_i32 : i32, i32
  }
}

</mosaic_0001>

<bundles_post_ra>
// kernel: tpu_custom_call.1
= control target key start
LH: loop header
LB: loop body
LE: loop exit
PB: predicated region body
PF: predicated region fallthrough
CT: control target
= control target key end

     0   :  { %8 = vsyncpa [#allocation3], 0  ;;  %s1190_s0 = inlined_call_operand.vmem [shape: bf16[16,32], index: 0, kind: input, shape index: {}]   ;;  %s1191_s1 = inlined_call_operand.vmem [shape: bf16[512,32], index: 1, kind: input, shape index: {}]   ;;  %s1192_s2 = inlined_call_operand.vmem [shape: f32[1,512], index: 2, kind: input, shape index: {}]   ;;  %s1193_s3 = inlined_call_operand.hbm [shape: f32[16,512], index: 3, kind: output, shape index: {}]  }
   0x1   :  { %10 = vsyncpa [#allocation3 + $0x1], 0  ;;  %s970_s12 = smov 0   ;;  %s972_s13 = smov 0  }
   0x2   :  { %s974_s14 = smov 0   ;;  %s976_s15 = smov 0  }
   0x3 LB: > { %s991_s16 = sadd.s32 4294967295, %s948_s15   ;;  %s661_s17 = sadd.s32 4294967294, %s948_s15   ;;  %s948_s15 = sphi %s976_s15, %s1199_s15   ;;  %s944_s14 = sphi %s974_s14, %s1198_s14   ;;  %s940_s13 = sphi %s972_s13, %s1197_s13   ;;  %s936_s12 = sphi %s970_s12, %s1196_s12  }
   0x4   : > { %s995_s18 = sadd.s32 1, %s948_s15   ;;  %s91_s19 = sadd.s32 1, %s944_s14 }
   0x5   : > { %s88_s20 = ssub.s32 %s948_s15, %s995_s18  ;;  %p101_p0 = scmp.ne.s32.totalorder %s944_s14, %s940_s13 }
   0x6   : > { %p89_p1 = scmp.eq.s32.totalorder %s88_s20, 0  ;;  %p102_p2 = scmp.eq.s32.totalorder %s991_s16, 1 }
   0x7   : > { %p107_p3 = scmp.ne.s32.totalorder %s940_s13, %s936_s12  ;;  %p108_p4 = scmp.eq.s32.totalorder %s661_s17, 1 }
   0x8   : > { %s1006_s21 = scalar_select %p89_p1, %s944_s14, %s91_s19  }
   0x9   : > { %p1008_p5 = por %p102_p2, %p101_p0  ;;  %p1012_p6 = por %p108_p4, %p107_p3 }
   0xa   : > { %p664_p7 = scmp.ge.s32.totalorder %s948_s15, 1  ;;  %p139_p8 = scmp.lt.s32.totalorder %s948_s15, 3 }
   0xc   : > { %p140_p9 = pnand %p664_p7, %p139_p8 }
   0xd   : > { %p162_p10 = scmp.lt.s32.totalorder (!%p140_p9), %s991_s16, 1  ;;  %s159_s20 = sand.u32 (!%p140_p9), 1, %s940_s13  }
   0xe   : > { %143 = sbr.rel (%p140_p9) target bundleno = 492 (0x1ec), region = 32  ;;  %s665_s24 = sshll.u32 (!%p140_p9), %s159_s20, 5 }
   0xf   : > { %s836_s25 = sshll.u32 (!%p140_p9), %s991_s16, 5  ;;  %s161_s29 = scalar_lea.vmem (!%p140_p9), [#allocation2], %s665_s24 }
  0x10   : > { %s597_s28 = scalar_lea.hbm (!%p140_p9), %s1193_s3, %s836_s25  ;;  %s599_s30 = sshll.u32 (!%p140_p9), %s161_s29, 4  ;;  %s600_s30 = int_to_ptr.vmem [resolvable:$true] %s599_s30 }
  0x11   : > { %s601_s4 = sshll.u32 (!%p140_p9), %s597_s28, 4  ;;  %s906_s9 = scalar_lea.hbm (!%p140_p9), %s1193_s3, 64  ;;  %s602_s4 = int_to_ptr.hbm [resolvable:$true] %s601_s4 }
  0x12   : > { %s900_s5 = sshra.s32 (!%p140_p9), %s602_s4, 4  ;;  %s901_s5 = int_to_ptr.hbm [resolvable:$true] %s900_s5 }
  0x13   : > { %v811_v0 = vld [vmem:[%s1191_s1 + $0x38] sm:$0xff]  ;;  %vm401_vm0 = vcmask 261120   ;;  %v810_v8 = vld [vmem:[%s1191_s1 + $0x30] sm:$0xff]  ;;  %v809_v16 = vld [vmem:[%s1191_s1 + $0x28] sm:$0xff]  ;;  %s163_s7 = scalar_select %p162_p10, %s991_s16, 1 }
  0x14   : > { %v819_v1 = vld [vmem:[%s1191_s1 + $0x78] sm:$0xff]  ;;  %v427_v4 = vsel %vm401_vm0, %v811_v0, 0  ;;  %v818_v9 = vld [vmem:[%s1191_s1 + $0x70] sm:$0xff]  ;;  %v424_v12 = vsel %vm401_vm0, %v810_v8, 0  ;;  %v817_v17 = vld [vmem:[%s1191_s1 + $0x68] sm:$0xff]  ;;  %v421_v20 = vsel %vm401_vm0, %v809_v16, 0  ;;  %p907_p0 = scmp.lt.s32.totalorder %s901_s5, %s1193_s3 }
  0x15   : > { %v827_v2 = vld [vmem:[%s1191_s1 + $0xb8] sm:$0xff]  ;;  %v451_v5 = vsel %vm401_vm0, %v819_v1, 0  ;;  %501 = vmatpush.bf16.xpose.msra.mxu0 %v427_v4  ;;  %v826_v10 = vld [vmem:[%s1191_s1 + $0xb0] sm:$0xff]  ;;  %v448_v13 = vsel %vm401_vm0, %v818_v9, 0  ;;  %v825_v18 = vld [vmem:[%s1191_s1 + $0xa8] sm:$0xff]  ;;  %v445_v21 = vsel %vm401_vm0, %v817_v17, 0 }
  0x16   : > { %v835_v3 = vld [vmem:[%s1191_s1 + $0xf8] sm:$0xff]  ;;  %v475_v6 = vsel %vm401_vm0, %v827_v2, 0  ;;  %514 = vmatpush.bf16.xpose.msra.mxu1 %v451_v5  ;;  %v834_v11 = vld [vmem:[%s1191_s1 + $0xf0] sm:$0xff]  ;;  %v472_v14 = vsel %vm401_vm0, %v826_v10, 0  ;;  %v833_v19 = vld [vmem:[%s1191_s1 + $0xe8] sm:$0xff]  ;;  %v469_v22 = vsel %vm401_vm0, %v825_v18, 0 }
  0x17   : > { %v499_v7 = vsel %vm401_vm0, %v835_v3, 0  ;;  %527 = vmatpush.bf16.xpose.msra.mxu2 %v475_v6  ;;  %v496_v15 = vsel %vm401_vm0, %v834_v11, 0  ;;  %v493_v23 = vsel %vm401_vm0, %v833_v19, 0  ;;  %v808_v24 = vld [vmem:[%s1191_s1 + $0x20] sm:$0xff]  ;;  %v807_v32 = vld [vmem:[%s1191_s1 + $0x18] sm:$0xff]  ;;  %v806_v40 = vld [vmem:[%s1191_s1 + $0x10] sm:$0xff] }
  0x18   : > { %540 = vmatpush.bf16.xpose.msra.mxu3 %v499_v7  ;;  %v816_v25 = vld [vmem:[%s1191_s1 + $0x60] sm:$0xff]  ;;  %v418_v28 = vsel %vm401_vm0, %v808_v24, 0  ;;  %v815_v33 = vld [vmem:[%s1191_s1 + $0x58] sm:$0xff]  ;;  %v415_v36 = vsel %vm401_vm0, %v807_v32, 0  ;;  %v814_v41 = vld [vmem:[%s1191_s1 + $0x50] sm:$0xff]  ;;  %v412_v44 = vsel %vm401_vm0, %v806_v40, 0 }
  0x19   : > { %v824_v26 = vld [vmem:[%s1191_s1 + $0xa0] sm:$0xff]  ;;  %v442_v29 = vsel %vm401_vm0, %v816_v25, 0  ;;  %v823_v34 = vld [vmem:[%s1191_s1 + $0x98] sm:$0xff]  ;;  %v439_v37 = vsel %vm401_vm0, %v815_v33, 0  ;;  %v822_v42 = vld [vmem:[%s1191_s1 + $0x90] sm:$0xff]  ;;  %v436_v45 = vsel %vm401_vm0, %v814_v41, 0 }
  0x1a   : > { %v832_v27 = vld [vmem:[%s1191_s1 + $0xe0] sm:$0xff]  ;;  %v466_v30 = vsel %vm401_vm0, %v824_v26, 0  ;;  %v831_v35 = vld [vmem:[%s1191_s1 + $0xd8] sm:$0xff]  ;;  %v463_v38 = vsel %vm401_vm0, %v823_v34, 0  ;;  %v830_v43 = vld [vmem:[%s1191_s1 + $0xd0] sm:$0xff]  ;;  %v460_v46 = vsel %vm401_vm0, %v822_v42, 0 }
  0x1b   : > { %v490_v31 = vsel %vm401_vm0, %v832_v27, 0  ;;  %v487_v39 = vsel %vm401_vm0, %v831_v35, 0  ;;  %v484_v47 = vsel %vm401_vm0, %v830_v43, 0  ;;  %v805_v48 = vld [vmem:[%s1191_s1 + $0x8] sm:$0xff]  ;;  %v804_v56 = vld [vmem:[%s1191_s1] sm:$0xff]  ;;  %s666_s8 = sshll.u32 %s163_s7, 2 }
  0x1c   : > { %v813_v49 = vld [vmem:[%s1191_s1 + $0x48] sm:$0xff]  ;;  %v409_v52 = vsel %vm401_vm0, %v805_v48, 0  ;;  %v812_v57 = vld [vmem:[%s1191_s1 + $0x40] sm:$0xff]  ;;  %v406_v60 = vsel %vm401_vm0, %v804_v56, 0  ;;  %s165_s11 = scalar_lea.vmem %s1190_s0, %s666_s8  ;;  %s586_s16 = scalar_lea.sflag [#allocation3], %s159_s20 }
  0x1d   : > { %502 = vmatpush.bf16.xpose.msra.mxu0 %v424_v12  ;;  %v821_v50 = vld [vmem:[%s1191_s1 + $0x88] sm:$0xff]  ;;  %v433_v53 = vsel %vm401_vm0, %v813_v49, 0  ;;  %v820_v58 = vld [vmem:[%s1191_s1 + $0x80] sm:$0xff]  ;;  %v430_v61 = vsel %vm401_vm0, %v812_v57, 0  ;;  %s902_s6 = scalar_lea.hbm %s901_s5, 32 }
  0x1e   : > { %515 = vmatpush.bf16.xpose.msra.mxu1 %v448_v13  ;;  %v829_v51 = vld [vmem:[%s1191_s1 + $0xc8] sm:$0xff]  ;;  %v457_v54 = vsel %vm401_vm0, %v821_v50, 0  ;;  %v828_v59 = vld [vmem:[%s1191_s1 + $0xc0] sm:$0xff]  ;;  %v454_v62 = vsel %vm401_vm0, %v820_v58, 0  ;;  %p903_p11 = scmp.ne.s32.totalorder %s901_s5, %s902_s6  ;;  %p908_p1 = scmp.lt.s32.totalorder %s906_s9, %s902_s6 }
  0x1f   : > { %528 = vmatpush.bf16.xpose.msra.mxu2 %v472_v14  ;;  %v481_v55 = vsel %vm401_vm0, %v829_v51, 0  ;;  %v478_v63 = vsel %vm401_vm0, %v828_v59, 0  ;;  %v166_v0 = vld [vmem:[%s165_s11] sm:$0xf] }
  0x20   : > { %541 = vmatpush.bf16.xpose.msra.mxu3 %v496_v15  ;;  %v231_v1 = vld [vmem:[%s1192_s2] sm:$0xf]  ;;  %p904_p12 = pnand %p903_p11, %p1008_p5  ;;  %p909_p2 = por %p908_p1, %p907_p0 }
  0x21   : > { %v233_v2 = vperm.slane %v231_v1, 0  ;;  %v234_v4 = vperm.slane %v231_v1, 1  ;;  %v235_v8 = vperm.slane %v231_v1, 2  ;;  %v236_v9 = vperm.slane %v231_v1, 3 }
  0x22   : > { %p905_p13 = pneg %p904_p12 }
  0x24   : > { %p910_p3 = pnand %p909_p2, %p905_p13 }
  0x25   : > { %503 = vmatpush.bf16.xpose.msra.mxu0 %v421_v20 }
  0x26   : > { %516 = vmatpush.bf16.xpose.msra.mxu1 %v445_v21 }
  0x27   : > { %529 = vmatpush.bf16.xpose.msra.mxu2 %v469_v22 }
  0x28   : > { %542 = vmatpush.bf16.xpose.msra.mxu3 %v493_v23 }
  0x2d   : > { %504 = vmatpush.bf16.xpose.msra.mxu0 %v418_v28 }
  0x2e   : > { %517 = vmatpush.bf16.xpose.msra.mxu1 %v442_v29 }
  0x2f   : > { %530 = vmatpush.bf16.xpose.msra.mxu2 %v466_v30 }
  0x30   : > { %543 = vmatpush.bf16.xpose.msra.mxu3 %v490_v31 }
  0x35   : > { %505 = vmatpush.bf16.xpose.msra.mxu0 %v415_v36 }
  0x36   : > { %518 = vmatpush.bf16.xpose.msra.mxu1 %v439_v37 }
  0x37   : > { %531 = vmatpush.bf16.xpose.msra.mxu2 %v463_v38 }
  0x38   : > { %544 = vmatpush.bf16.xpose.msra.mxu3 %v487_v39 }
  0x3d   : > { %506 = vmatpush.bf16.xpose.msra.mxu0 %v412_v44 }
  0x3e   : > { %519 = vmatpush.bf16.xpose.msra.mxu1 %v436_v45 }
  0x3f   : > { %532 = vmatpush.bf16.xpose.msra.mxu2 %v460_v46 }
  0x40   : > { %545 = vmatpush.bf16.xpose.msra.mxu3 %v484_v47 }
  0x45   : > { %507 = vmatpush.bf16.xpose.msra.mxu0 %v409_v52 }
  0x46   : > { %520 = vmatpush.bf16.xpose.msra.mxu1 %v433_v53 }
  0x47   : > { %533 = vmatpush.bf16.xpose.msra.mxu2 %v457_v54 }
  0x48   : > { %546 = vmatpush.bf16.xpose.msra.mxu3 %v481_v55 }
  0x4d   : > { %508 = vmatpush.bf16.xpose.msra.mxu0 %v406_v60 }
  0x4e   : > { %521 = vmatpush.bf16.xpose.msra.mxu1 %v430_v61 }
  0x4f   : > { %534 = vmatpush.bf16.xpose.msra.mxu2 %v454_v62 }
  0x50   : > { %547 = vmatpush.bf16.xpose.msra.mxu3 %v478_v63 }
  0x54   : > { %795 = vmatmul.msk.bf16.vlgmr.msra.gmra.mxu0 %vm401_vm0, %v166_v0 }
  0x55   : > { %796 = vmatmul.msk.bf16.vlgmr.msra.gmra.mxu1 %vm401_vm0, %v166_v0 }
  0x56   : > { %797 = vmatmul.msk.bf16.vlgmr.msra.gmra.mxu2 %vm401_vm0, %v166_v0 }
  0x57   : > { %798 = vmatmul.msk.bf16.vlgmr.msra.gmra.mxu3 %vm401_vm0, %v166_v0 }
  0xd1   : > { %v510_v3 = vpop.f32.mrf.mxu0 }
  0xd2   : > { %v523_v5 = vpop.f32.mrf.mxu1  ;;  %v511_v6 = vadd.f32 %v510_v3, %v233_v2 }
  0xd3   : > { %v524_v7 = vadd.f32 %v523_v5, %v234_v4 }
  0xd5   : > { %v553_v16 = vmax.f32 %v511_v6, %v524_v7 }
  0xd9   : > { %v536_v10 = vpop.f32.mrf.mxu2  ;;  %v512_v14 = vpop.f32.mrf.mxu0 }
  0xda   : > { %v549_v11 = vpop.f32.mrf.mxu3  ;;  %v537_v12 = vadd.f32 %v536_v10, %v235_v8  ;;  %v525_v15 = vpop.f32.mrf.mxu1 }
  0xdb   : > { %v550_v13 = vadd.f32 %v549_v11, %v236_v9 }
  0xdd   : > { %v554_v17 = vmax.f32 %v537_v12, %v550_v13 }
  0xdf   : > { %v555_v18 = vmax.f32 %v553_v16, %v554_v17 }
  0xe1   : > { %556 = vmax.xlane.f32.xlu0 %v555_v18  ;;  %v538_v19 = vpop.f32.mrf.mxu2 }
  0xe2   : > { %v551_v20 = vpop.f32.mrf.mxu3 }
 0x154   : > { %v557_v21 = vpop.xlane.xlu0 %556 }
 0x155   : > { %v558_v22 = vsub.f32 %v511_v6, %v557_v21  ;;  %v559_v23 = vsub.f32 %v524_v7, %v557_v21  ;;  %v560_v24 = vsub.f32 %v537_v12, %v557_v21  ;;  %v561_v25 = vsub.f32 %v550_v13, %v557_v21 }
 0x157   : > { %v562_v26 = vmul.f32 1.442695, %v558_v22  ;;  %v564_v27 = vmul.f32 1.442695, %v559_v23  ;;  %v566_v28 = vmul.f32 1.442695, %v560_v24 }
 0x158   : > { %v568_v29 = vmul.f32 1.442695, %v561_v25 }
 0x159   : > { %876 = vpow2.f32 %v562_v26 }
 0x15a   : > { %878 = vpow2.f32 %v564_v27 }
 0x15b   : > { %880 = vpow2.f32 %v566_v28 }
 0x15c   : > { %882 = vpow2.f32 %v568_v29 }
 0x15f   : > { %v877_v30 = vpop.eup %876 }
 0x160   : > { %v879_v31 = vpop.eup %878 }
 0x161   : > { %v570_v32 = vadd.f32 %v879_v31, %v877_v30  ;;  %v881_v33 = vpop.eup %880 }
 0x162   : > { %v883_v35 = vpop.eup %882 }
 0x163   : > { %v571_v34 = vadd.f32 %v881_v33, %v570_v32 }
 0x165   : > { %v572_v36 = vadd.f32 %v883_v35, %v571_v34 }
 0x167   : > { %573 = vadd.xlane.f32.xlu0 %v572_v36 }
 0x1da   : > { %v574_v37 = vpop.xlane.xlu0 %573 }
 0x1db   : > { %884 = vlog2.f32 %v574_v37 }
 0x1e1   : > { %v885_v38 = vpop.eup %884 }
 0x1e2   : > { %v576_v39 = vmul.f32 0.6931472, %v885_v38 }
 0x1e4   : > { %v577_v40 = vsub.f32 %v558_v22, %v576_v39  ;;  %v578_v41 = vsub.f32 %v559_v23, %v576_v39  ;;  %v579_v42 = vsub.f32 %v560_v24, %v576_v39  ;;  %v580_v43 = vsub.f32 %v561_v25, %v576_v39 }
 0x1e6   : > { %581 = vst [vmem:[%s161_s29] sm:$0xff] %v577_v40 }
 0x1e7   : > { %582 = vst [vmem:[%s161_s29 + $0x8] sm:$0xff] %v578_v41 }
 0x1e8   : > { %583 = vst [vmem:[%s161_s29 + $0x10] sm:$0xff] %v579_v42 }
 0x1e9   : > { %584 = vst [vmem:[%s161_s29 + $0x18] sm:$0xff] %v580_v43 }
 0x1ea   : > { %913 = shalt.err (!%p910_p3)
}
 0x1eb   : > { %837 = dma.vmem_to_hbm [thread:$0]  (%p1008_p5), %s600_s30, 512, %s602_s4, %s586_s16  }
 0x1ec PF: > { %p843_p4 = scmp.ge.s32.totalorder %s948_s15, 2  ;;  %s613_s17 = sand.u32 1, %s936_s12  }
 0x1ed   : > { %s614_s19 = scalar_lea.sflag [#allocation3], %s613_s17 }
 0x1ee   : > { %p840_p7 = pnand %p843_p4, %p1012_p6 }
 0x1f0   : > { %p841_p8 = pneg %p840_p7 }
 0x1f2   : > { %931 = dma.done.wait (%p841_p8), %s614_s19, 512  }
 0x1f3   : > { %933 = vsyncadd (%p841_p8), %s614_s19, 4294966784  ;;  %p13_p9 = scmp.ge.s32.totalorder %s995_s18, 4   ;;  %s1196_s12 = smov %s940_s13 }
 0x1f4   : > { %s1197_s13 = smov %s944_s14  ;;  %s1198_s14 = smov %s1006_s21 }
 0x1f5   : > { %s1199_s15 = smov %s995_s18  ;;  %15 = sbr.rel (!%p13_p9) target bundleno = 3 (0x3), region = 67 }
 0x1fa   :  { %620 = vsyncpa [#allocation3], 1 }
 0x1fb   :  { %622 = vsyncpa [#allocation3 + $0x1], 1 }

// kernel: tpu_custom_call.1
= control target key start
LH: loop header
LB: loop body
LE: loop exit
PB: predicated region body
PF: predicated region fallthrough
CT: control target
= control target key end

     0   :  { %8 = vsyncpa [#allocation3], 0  ;;  %s1190_s0 = inlined_call_operand.vmem [shape: bf16[16,32], index: 0, kind: input, shape index: {}]   ;;  %s1191_s1 = inlined_call_operand.vmem [shape: bf16[512,32], index: 1, kind: input, shape index: {}]   ;;  %s1192_s2 = inlined_call_operand.vmem [shape: f32[1,512], index: 2, kind: input, shape index: {}]   ;;  %s1193_s3 = inlined_call_operand.hbm [shape: f32[16,512], index: 3, kind: output, shape index: {}]  }
   0x1   :  { %10 = vsyncpa [#allocation3 + $0x1], 0  ;;  %s970_s12 = smov 0   ;;  %s972_s13 = smov 0  }
   0x2   :  { %s974_s14 = smov 0   ;;  %s976_s15 = smov 0  }
   0x3 LB: > { %s991_s16 = sadd.s32 4294967295, %s948_s15   ;;  %s661_s17 = sadd.s32 4294967294, %s948_s15   ;;  %s948_s15 = sphi %s976_s15, %s1199_s15   ;;  %s944_s14 = sphi %s974_s14, %s1198_s14   ;;  %s940_s13 = sphi %s972_s13, %s1197_s13   ;;  %s936_s12 = sphi %s970_s12, %s1196_s12  }
   0x4   : > { %s995_s18 = sadd.s32 1, %s948_s15   ;;  %s91_s19 = sadd.s32 1, %s944_s14 }
   0x5   : > { %s88_s20 = ssub.s32 %s948_s15, %s995_s18  ;;  %p101_p0 = scmp.ne.s32.totalorder %s944_s14, %s940_s13 }
   0x6   : > { %p89_p1 = scmp.eq.s32.totalorder %s88_s20, 0  ;;  %p102_p2 = scmp.eq.s32.totalorder %s991_s16, 1 }
   0x7   : > { %p107_p3 = scmp.ne.s32.totalorder %s940_s13, %s936_s12  ;;  %p108_p4 = scmp.eq.s32.totalorder %s661_s17, 1 }
   0x8   : > { %s1006_s21 = scalar_select %p89_p1, %s944_s14, %s91_s19  }
   0x9   : > { %p1008_p5 = por %p102_p2, %p101_p0  ;;  %p1012_p6 = por %p108_p4, %p107_p3 }
   0xa   : > { %p664_p7 = scmp.ge.s32.totalorder %s948_s15, 1  ;;  %p139_p8 = scmp.lt.s32.totalorder %s948_s15, 3 }
   0xc   : > { %p140_p9 = pnand %p664_p7, %p139_p8 }
   0xd   : > { %p162_p10 = scmp.lt.s32.totalorder (!%p140_p9), %s991_s16, 1  ;;  %s159_s20 = sand.u32 (!%p140_p9), 1, %s940_s13  }
   0xe   : > { %143 = sbr.rel (%p140_p9) target bundleno = 492 (0x1ec), region = 32  ;;  %s665_s24 = sshll.u32 (!%p140_p9), %s159_s20, 5 }
   0xf   : > { %s836_s25 = sshll.u32 (!%p140_p9), %s991_s16, 5  ;;  %s161_s29 = scalar_lea.vmem (!%p140_p9), [#allocation2], %s665_s24 }
  0x10   : > { %s597_s28 = scalar_lea.hbm (!%p140_p9), %s1193_s3, %s836_s25  ;;  %s599_s30 = sshll.u32 (!%p140_p9), %s161_s29, 4  ;;  %s600_s30 = int_to_ptr.vmem [resolvable:$true] %s599_s30 }
  0x11   : > { %s601_s4 = sshll.u32 (!%p140_p9), %s597_s28, 4  ;;  %s906_s9 = scalar_lea.hbm (!%p140_p9), %s1193_s3, 64  ;;  %s602_s4 = int_to_ptr.hbm [resolvable:$true] %s601_s4 }
  0x12   : > { %s900_s5 = sshra.s32 (!%p140_p9), %s602_s4, 4  ;;  %s901_s5 = int_to_ptr.hbm [resolvable:$true] %s900_s5 }
  0x13   : > { %v811_v0 = vld [vmem:[%s1191_s1 + $0x38] sm:$0xff]  ;;  %vm401_vm0 = vcmask 261120   ;;  %v810_v8 = vld [vmem:[%s1191_s1 + $0x30] sm:$0xff]  ;;  %v809_v16 = vld [vmem:[%s1191_s1 + $0x28] sm:$0xff]  ;;  %s163_s7 = scalar_select %p162_p10, %s991_s16, 1 }
  0x14   : > { %v819_v1 = vld [vmem:[%s1191_s1 + $0x78] sm:$0xff]  ;;  %v427_v4 = vsel %vm401_vm0, %v811_v0, 0  ;;  %v818_v9 = vld [vmem:[%s1191_s1 + $0x70] sm:$0xff]  ;;  %v424_v12 = vsel %vm401_vm0, %v810_v8, 0  ;;  %v817_v17 = vld [vmem:[%s1191_s1 + $0x68] sm:$0xff]  ;;  %v421_v20 = vsel %vm401_vm0, %v809_v16, 0  ;;  %p907_p0 = scmp.lt.s32.totalorder %s901_s5, %s1193_s3 }
  0x15   : > { %v827_v2 = vld [vmem:[%s1191_s1 + $0xb8] sm:$0xff]  ;;  %v451_v5 = vsel %vm401_vm0, %v819_v1, 0  ;;  %501 = vmatpush.bf16.xpose.msra.mxu0 %v427_v4  ;;  %v826_v10 = vld [vmem:[%s1191_s1 + $0xb0] sm:$0xff]  ;;  %v448_v13 = vsel %vm401_vm0, %v818_v9, 0  ;;  %v825_v18 = vld [vmem:[%s1191_s1 + $0xa8] sm:$0xff]  ;;  %v445_v21 = vsel %vm401_vm0, %v817_v17, 0 }
  0x16   : > { %v835_v3 = vld [vmem:[%s1191_s1 + $0xf8] sm:$0xff]  ;;  %v475_v6 = vsel %vm401_vm0, %v827_v2, 0  ;;  %514 = vmatpush.bf16.xpose.msra.mxu1 %v451_v5  ;;  %v834_v11 = vld [vmem:[%s1191_s1 + $0xf0] sm:$0xff]  ;;  %v472_v14 = vsel %vm401_vm0, %v826_v10, 0  ;;  %v833_v19 = vld [vmem:[%s1191_s1 + $0xe8] sm:$0xff]  ;;  %v469_v22 = vsel %vm401_vm0, %v825_v18, 0 }
  0x17   : > { %v499_v7 = vsel %vm401_vm0, %v835_v3, 0  ;;  %527 = vmatpush.bf16.xpose.msra.mxu2 %v475_v6  ;;  %v496_v15 = vsel %vm401_vm0, %v834_v11, 0  ;;  %v493_v23 = vsel %vm401_vm0, %v833_v19, 0  ;;  %v808_v24 = vld [vmem:[%s1191_s1 + $0x20] sm:$0xff]  ;;  %v807_v32 = vld [vmem:[%s1191_s1 + $0x18] sm:$0xff]  ;;  %v806_v40 = vld [vmem:[%s1191_s1 + $0x10] sm:$0xff] }
  0x18   : > { %540 = vmatpush.bf16.xpose.msra.mxu3 %v499_v7  ;;  %v816_v25 = vld [vmem:[%s1191_s1 + $0x60] sm:$0xff]  ;;  %v418_v28 = vsel %vm401_vm0, %v808_v24, 0  ;;  %v815_v33 = vld [vmem:[%s1191_s1 + $0x58] sm:$0xff]  ;;  %v415_v36 = vsel %vm401_vm0, %v807_v32, 0  ;;  %v814_v41 = vld [vmem:[%s1191_s1 + $0x50] sm:$0xff]  ;;  %v412_v44 = vsel %vm401_vm0, %v806_v40, 0 }
  0x19   : > { %v824_v26 = vld [vmem:[%s1191_s1 + $0xa0] sm:$0xff]  ;;  %v442_v29 = vsel %vm401_vm0, %v816_v25, 0  ;;  %v823_v34 = vld [vmem:[%s1191_s1 + $0x98] sm:$0xff]  ;;  %v439_v37 = vsel %vm401_vm0, %v815_v33, 0  ;;  %v822_v42 = vld [vmem:[%s1191_s1 + $0x90] sm:$0xff]  ;;  %v436_v45 = vsel %vm401_vm0, %v814_v41, 0 }
  0x1a   : > { %v832_v27 = vld [vmem:[%s1191_s1 + $0xe0] sm:$0xff]  ;;  %v466_v30 = vsel %vm401_vm0, %v824_v26, 0  ;;  %v831_v35 = vld [vmem:[%s1191_s1 + $0xd8] sm:$0xff]  ;;  %v463_v38 = vsel %vm401_vm0, %v823_v34, 0  ;;  %v830_v43 = vld [vmem:[%s1191_s1 + $0xd0] sm:$0xff]  ;;  %v460_v46 = vsel %vm401_vm0, %v822_v42, 0 }
  0x1b   : > { %v490_v31 = vsel %vm401_vm0, %v832_v27, 0  ;;  %v487_v39 = vsel %vm401_vm0, %v831_v35, 0  ;;  %v484_v47 = vsel %vm401_vm0, %v830_v43, 0  ;;  %v805_v48 = vld [vmem:[%s1191_s1 + $0x8] sm:$0xff]  ;;  %v804_v56 = vld [vmem:[%s1191_s1] sm:$0xff]  ;;  %s666_s8 = sshll.u32 %s163_s7, 2 }
  0x1c   : > { %v813_v49 = vld [vmem:[%s1191_s1 + $0x48] sm:$0xff]  ;;  %v409_v52 = vsel %vm401_vm0, %v805_v48, 0  ;;  %v812_v57 = vld [vmem:[%s1191_s1 + $0x40] sm:$0xff]  ;;  %v406_v60 = vsel %vm401_vm0, %v804_v56, 0  ;;  %s165_s11 = scalar_lea.vmem %s1190_s0, %s666_s8  ;;  %s586_s16 = scalar_lea.sflag [#allocation3], %s159_s20 }
  0x1d   : > { %502 = vmatpush.bf16.xpose.msra.mxu0 %v424_v12  ;;  %v821_v50 = vld [vmem:[%s1191_s1 + $0x88] sm:$0xff]  ;;  %v433_v53 = vsel %vm401_vm0, %v813_v49, 0  ;;  %v820_v58 = vld [vmem:[%s1191_s1 + $0x80] sm:$0xff]  ;;  %v430_v61 = vsel %vm401_vm0, %v812_v57, 0  ;;  %s902_s6 = scalar_lea.hbm %s901_s5, 32 }
  0x1e   : > { %515 = vmatpush.bf16.xpose.msra.mxu1 %v448_v13  ;;  %v829_v51 = vld [vmem:[%s1191_s1 + $0xc8] sm:$0xff]  ;;  %v457_v54 = vsel %vm401_vm0, %v821_v50, 0  ;;  %v828_v59 = vld [vmem:[%s1191_s1 + $0xc0] sm:$0xff]  ;;  %v454_v62 = vsel %vm401_vm0, %v820_v58, 0  ;;  %p903_p11 = scmp.ne.s32.totalorder %s901_s5, %s902_s6  ;;  %p908_p1 = scmp.lt.s32.totalorder %s906_s9, %s902_s6 }
  0x1f   : > { %528 = vmatpush.bf16.xpose.msra.mxu2 %v472_v14  ;;  %v481_v55 = vsel %vm401_vm0, %v829_v51, 0  ;;  %v478_v63 = vsel %vm401_vm0, %v828_v59, 0  ;;  %v166_v0 = vld [vmem:[%s165_s11] sm:$0xf] }
  0x20   : > { %541 = vmatpush.bf16.xpose.msra.mxu3 %v496_v15  ;;  %v231_v1 = vld [vmem:[%s1192_s2] sm:$0xf]  ;;  %p904_p12 = pnand %p903_p11, %p1008_p5  ;;  %p909_p2 = por %p908_p1, %p907_p0 }
  0x21   : > { %v233_v2 = vperm.slane %v231_v1, 0  ;;  %v234_v4 = vperm.slane %v231_v1, 1  ;;  %v235_v8 = vperm.slane %v231_v1, 2  ;;  %v236_v9 = vperm.slane %v231_v1, 3 }
  0x22   : > { %p905_p13 = pneg %p904_p12 }
  0x24   : > { %p910_p3 = pnand %p909_p2, %p905_p13 }
  0x25   : > { %503 = vmatpush.bf16.xpose.msra.mxu0 %v421_v20 }
  0x26   : > { %516 = vmatpush.bf16.xpose.msra.mxu1 %v445_v21 }
  0x27   : > { %529 = vmatpush.bf16.xpose.msra.mxu2 %v469_v22 }
  0x28   : > { %542 = vmatpush.bf16.xpose.msra.mxu3 %v493_v23 }
  0x2d   : > { %504 = vmatpush.bf16.xpose.msra.mxu0 %v418_v28 }
  0x2e   : > { %517 = vmatpush.bf16.xpose.msra.mxu1 %v442_v29 }
  0x2f   : > { %530 = vmatpush.bf16.xpose.msra.mxu2 %v466_v30 }
  0x30   : > { %543 = vmatpush.bf16.xpose.msra.mxu3 %v490_v31 }
  0x35   : > { %505 = vmatpush.bf16.xpose.msra.mxu0 %v415_v36 }
  0x36   : > { %518 = vmatpush.bf16.xpose.msra.mxu1 %v439_v37 }
  0x37   : > { %531 = vmatpush.bf16.xpose.msra.mxu2 %v463_v38 }
  0x38   : > { %544 = vmatpush.bf16.xpose.msra.mxu3 %v487_v39 }
  0x3d   : > { %506 = vmatpush.bf16.xpose.msra.mxu0 %v412_v44 }
  0x3e   : > { %519 = vmatpush.bf16.xpose.msra.mxu1 %v436_v45 }
  0x3f   : > { %532 = vmatpush.bf16.xpose.msra.mxu2 %v460_v46 }
  0x40   : > { %545 = vmatpush.bf16.xpose.msra.mxu3 %v484_v47 }
  0x45   : > { %507 = vmatpush.bf16.xpose.msra.mxu0 %v409_v52 }
  0x46   : > { %520 = vmatpush.bf16.xpose.msra.mxu1 %v433_v53 }
  0x47   : > { %533 = vmatpush.bf16.xpose.msra.mxu2 %v457_v54 }
  0x48   : > { %546 = vmatpush.bf16.xpose.msra.mxu3 %v481_v55 }
  0x4d   : > { %508 = vmatpush.bf16.xpose.msra.mxu0 %v406_v60 }
  0x4e   : > { %521 = vmatpush.bf16.xpose.msra.mxu1 %v430_v61 }
  0x4f   : > { %534 = vmatpush.bf16.xpose.msra.mxu2 %v454_v62 }
  0x50   : > { %547 = vmatpush.bf16.xpose.msra.mxu3 %v478_v63 }
  0x54   : > { %795 = vmatmul.msk.bf16.vlgmr.msra.gmra.mxu0 %vm401_vm0, %v166_v0 }
  0x55   : > { %796 = vmatmul.msk.bf16.vlgmr.msra.gmra.mxu1 %vm401_vm0, %v166_v0 }
  0x56   : > { %797 = vmatmul.msk.bf16.vlgmr.msra.gmra.mxu2 %vm401_vm0, %v166_v0 }
  0x57   : > { %798 = vmatmul.msk.bf16.vlgmr.msra.gmra.mxu3 %vm401_vm0, %v166_v0 }
  0xd1   : > { %v510_v3 = vpop.f32.mrf.mxu0 }
  0xd2   : > { %v523_v5 = vpop.f32.mrf.mxu1  ;;  %v511_v6 = vadd.f32 %v510_v3, %v233_v2 }
  0xd3   : > { %v524_v7 = vadd.f32 %v523_v5, %v234_v4 }
  0xd5   : > { %v553_v16 = vmax.f32 %v511_v6, %v524_v7 }
  0xd9   : > { %v536_v10 = vpop.f32.mrf.mxu2  ;;  %v512_v14 = vpop.f32.mrf.mxu0 }
  0xda   : > { %v549_v11 = vpop.f32.mrf.mxu3  ;;  %v537_v12 = vadd.f32 %v536_v10, %v235_v8  ;;  %v525_v15 = vpop.f32.mrf.mxu1 }
  0xdb   : > { %v550_v13 = vadd.f32 %v549_v11, %v236_v9 }
  0xdd   : > { %v554_v17 = vmax.f32 %v537_v12, %v550_v13 }
  0xdf   : > { %v555_v18 = vmax.f32 %v553_v16, %v554_v17 }
  0xe1   : > { %556 = vmax.xlane.f32.xlu0 %v555_v18  ;;  %v538_v19 = vpop.f32.mrf.mxu2 }
  0xe2   : > { %v551_v20 = vpop.f32.mrf.mxu3 }
 0x154   : > { %v557_v21 = vpop.xlane.xlu0 %556 }
 0x155   : > { %v558_v22 = vsub.f32 %v511_v6, %v557_v21  ;;  %v559_v23 = vsub.f32 %v524_v7, %v557_v21  ;;  %v560_v24 = vsub.f32 %v537_v12, %v557_v21  ;;  %v561_v25 = vsub.f32 %v550_v13, %v557_v21 }
 0x157   : > { %v562_v26 = vmul.f32 1.442695, %v558_v22  ;;  %v564_v27 = vmul.f32 1.442695, %v559_v23  ;;  %v566_v28 = vmul.f32 1.442695, %v560_v24 }
 0x158   : > { %v568_v29 = vmul.f32 1.442695, %v561_v25 }
 0x159   : > { %876 = vpow2.f32 %v562_v26 }
 0x15a   : > { %878 = vpow2.f32 %v564_v27 }
 0x15b   : > { %880 = vpow2.f32 %v566_v28 }
 0x15c   : > { %882 = vpow2.f32 %v568_v29 }
 0x15f   : > { %v877_v30 = vpop.eup %876 }
 0x160   : > { %v879_v31 = vpop.eup %878 }
 0x161   : > { %v570_v32 = vadd.f32 %v879_v31, %v877_v30  ;;  %v881_v33 = vpop.eup %880 }
 0x162   : > { %v883_v35 = vpop.eup %882 }
 0x163   : > { %v571_v34 = vadd.f32 %v881_v33, %v570_v32 }
 0x165   : > { %v572_v36 = vadd.f32 %v883_v35, %v571_v34 }
 0x167   : > { %573 = vadd.xlane.f32.xlu0 %v572_v36 }
 0x1da   : > { %v574_v37 = vpop.xlane.xlu0 %573 }
 0x1db   : > { %884 = vlog2.f32 %v574_v37 }
 0x1e1   : > { %v885_v38 = vpop.eup %884 }
 0x1e2   : > { %v576_v39 = vmul.f32 0.6931472, %v885_v38 }
 0x1e4   : > { %v577_v40 = vsub.f32 %v558_v22, %v576_v39  ;;  %v578_v41 = vsub.f32 %v559_v23, %v576_v39  ;;  %v579_v42 = vsub.f32 %v560_v24, %v576_v39  ;;  %v580_v43 = vsub.f32 %v561_v25, %v576_v39 }
 0x1e6   : > { %581 = vst [vmem:[%s161_s29] sm:$0xff] %v577_v40 }
 0x1e7   : > { %582 = vst [vmem:[%s161_s29 + $0x8] sm:$0xff] %v578_v41 }
 0x1e8   : > { %583 = vst [vmem:[%s161_s29 + $0x10] sm:$0xff] %v579_v42 }
 0x1e9   : > { %584 = vst [vmem:[%s161_s29 + $0x18] sm:$0xff] %v580_v43 }
 0x1ea   : > { %913 = shalt.err (!%p910_p3)
}
 0x1eb   : > { %837 = dma.vmem_to_hbm [thread:$0]  (%p1008_p5), %s600_s30, 512, %s602_s4, %s586_s16  }
 0x1ec PF: > { %p843_p4 = scmp.ge.s32.totalorder %s948_s15, 2  ;;  %s613_s17 = sand.u32 1, %s936_s12  }
 0x1ed   : > { %s614_s19 = scalar_lea.sflag [#allocation3], %s613_s17 }
 0x1ee   : > { %p840_p7 = pnand %p843_p4, %p1012_p6 }
 0x1f0   : > { %p841_p8 = pneg %p840_p7 }
 0x1f2   : > { %931 = dma.done.wait (%p841_p8), %s614_s19, 512  }
 0x1f3   : > { %933 = vsyncadd (%p841_p8), %s614_s19, 4294966784  ;;  %p13_p9 = scmp.ge.s32.totalorder %s995_s18, 4   ;;  %s1196_s12 = smov %s940_s13 }
 0x1f4   : > { %s1197_s13 = smov %s944_s14  ;;  %s1198_s14 = smov %s1006_s21 }
 0x1f5   : > { %s1199_s15 = smov %s995_s18  ;;  %15 = sbr.rel (!%p13_p9) target bundleno = 3 (0x3), region = 67 }
 0x1fa   :  { %620 = vsyncpa [#allocation3], 1 }
 0x1fb   :  { %622 = vsyncpa [#allocation3 + $0x1], 1 }

</bundles_post_ra>
